<compile_context>
chip_gen: v6e
topology: v6e:2x2x1
jax: 0.10.0
libtpu: 0.0.40
codegen_flags: <defaults>
</compile_context>

<pallas_src>
import math
import functools

import numpy as np
import jax
import jax.numpy as jnp
from jax.experimental import pallas as pl
from jax.experimental.pallas import tpu as pltpu


def _prob_attn_kernel(idx_col_ref, idx_row_ref, q_ref, k_ref, v_ref, base_ref,
                      o_ref, *, scale, HP):
    """ProbSparse attention hot path for one (batch, head-group) grid step.

    idx_col_ref : (1, HP, u_pad, 1)  int32 selected-query positions (column form)
    idx_row_ref : (1, HP, 1, u_pad)  int32 selected-query positions (row form)
    q_ref       : (1, HP, u_pad, D)  bf16 selected ("top-u") queries
    k_ref       : (1, HP, L_K, D)    bf16 keys
    v_ref       : (1, HP, L_K, D)    bf16 values
    base_ref    : (1, HP, L_Q, D)    bf16 initial context (cumsum of V, f32-accumulated)
    o_ref       : (1, L_Q, HP*D)     bf16 output, group heads concatenated on lanes
    """
    u_pad = q_ref.shape[2]
    L_K = k_ref.shape[2]
    L_Q = base_ref.shape[2]

    # Head-invariant iotas hoisted out of the head loop (no CSE of broadcasts).
    col = jax.lax.broadcasted_iota(jnp.int32, (u_pad, L_K), 1)   # key positions
    row = jax.lax.broadcasted_iota(jnp.int32, (L_Q, u_pad), 0)   # query positions

    outs = []
    for h in range(HP):                      # small static unroll (HP heads)
        q = q_ref[0, h]                      # (u_pad, D)   bf16
        k = k_ref[0, h]                      # (L_K, D)     bf16
        v = v_ref[0, h]                      # (L_K, D)     bf16
        base = base_ref[0, h]                # (L_Q, D)     bf16
        idx_c = idx_col_ref[0, h]            # (u_pad, 1)   i32
        idx_r = idx_row_ref[0, h]            # (1, u_pad)   i32

        # scores_top = Q_reduce @ K^T * scale  (bf16 x bf16 -> f32 on the MXU)
        scores = jax.lax.dot_general(
            q, k, (((1,), (1,)), ((), ())),
            preferred_element_type=jnp.float32) * scale          # (u_pad, L_K)

        # ProbMask: for a selected query at position p, mask key positions j > p.
        # (self-attention path: L_K == L_Q; pad-sentinel rows carry idx == L_Q
        #  so they are never fully masked -> no NaN.)
        scores = jnp.where(col > idx_c, -jnp.inf, scores)

        # softmax over keys (f32 math; EUP approx reciprocal for the denom)
        m = jnp.max(scores, axis=-1, keepdims=True)
        e = jnp.exp(scores - m)
        denom = jnp.sum(e, axis=-1, keepdims=True)
        attn = e * pl.reciprocal(denom, approx=True)

        # attention output for the selected queries
        ctx_sel = jnp.dot(attn.astype(jnp.bfloat16), v,
                          preferred_element_type=jnp.float32)    # (u_pad, D)

        # one-hot scatter built in-kernel: oh[l, j] = 1 iff selected query j is
        # at sequence position l.  bf16 one-hot matmul (exact 0/1), f32 acc.
        onehot = (row == idx_r)                                  # (L_Q, u_pad) bool
        oh = onehot.astype(jnp.bfloat16)
        sel = jnp.max(onehot.astype(jnp.int32), axis=-1,
                      keepdims=True) > 0                         # (L_Q, 1) bool
        scattered = jnp.dot(oh, ctx_sel.astype(jnp.bfloat16),
                            preferred_element_type=jnp.float32)  # (L_Q, D)

        # single vselect instead of arithmetic blend
        outs.append(jnp.where(sel, scattered.astype(jnp.bfloat16), base))

    # one lane-dense store of the (L_Q, HP*D) group slab
    o_ref[0] = outs[0] if HP == 1 else jnp.concatenate(outs, axis=-1)


def _pick_head_group(H, D):
    """Smallest divisor hp of H with hp*D a multiple of 128 (lane-dense store);
    falls back to all heads per step (block == full lane dim is always legal)."""
    for hp in range(1, H + 1):
        if H % hp == 0 and (hp * D) % 128 == 0:
            return hp
    return H


def _prob_select(Q, K, factor, sample_key):
    """ProbSparse query selection (sampling + topk) — glue in plain JAX."""
    B, H, L_Q, D = Q.shape
    L_K = K.shape[2]
    U_part = min(factor * int(np.ceil(np.log(L_K))), L_K)
    u = min(factor * int(np.ceil(np.log(L_Q))), L_Q)

    # index_sample = torch.randint(L_K, (L_Q, sample_k))
    idx_sample = jax.random.randint(sample_key, (L_Q, U_part), 0, L_K)
    # TODO(synk): fuse this gather + sampled-QK einsum into a Pallas kernel with
    # idx_sample in SMEM (PrefetchScalarGridSpec scalar prefetch) so the
    # (B,H,L_Q,U_part,D) intermediate is never materialized at Informer-scale L.
    Q_bf = Q.astype(jnp.bfloat16)
    K_bf = K.astype(jnp.bfloat16)
    K_sample = jnp.take(K_bf, idx_sample, axis=2)                # (B,H,L_Q,U_part,D) bf16
    QK_sample = jnp.einsum('bhid,bhijd->bhij', Q_bf, K_sample,
                           preferred_element_type=jnp.float32)   # (B,H,L_Q,U_part)
    M = QK_sample.max(-1) - QK_sample.sum(-1) / L_K              # sparsity measure
    _, M_top = jax.lax.top_k(M, u)                               # (B,H,u)
    M_top = M_top.astype(jnp.int32)
    Q_red = jnp.take_along_axis(Q, M_top[..., None], axis=2)     # (B,H,u,D) f32
    return Q_red, M_top, u


def prob_attention(queries, keys, values, sample_key, factor=5, scale=None):
    """ProbAttention.forward (mask_flag=True, output_attention=False)."""
    B, L_Q, H, D = queries.shape
    _, L_K, _, _ = keys.shape
    assert L_Q == L_K, "mask_flag=True (cumsum/ProbMask) path assumes self-attention"

    Q = jnp.transpose(queries, (0, 2, 1, 3)).astype(jnp.float32)   # (B,H,L_Q,D)
    K = jnp.transpose(keys, (0, 2, 1, 3)).astype(jnp.float32)      # (B,H,L_K,D)
    V = jnp.transpose(values, (0, 2, 1, 3)).astype(jnp.float32)    # (B,H,L_V,D)

    Q_red, M_top, u = _prob_select(Q, K, factor, sample_key)
    scale_v = float(scale) if scale is not None else 1.0 / math.sqrt(D)

    # initial context = cumsum(V) along the sequence dim (mask_flag=True path),
    # accumulated in f32 by XLA; only the streamed result is cast to bf16.
    ctx_base = jnp.cumsum(V, axis=2).astype(jnp.bfloat16)          # (B,H,L_Q,D) bf16

    # pad u up to a multiple of 8 (sublane alignment); padded rows point at an
    # out-of-range sentinel (L_Q) so their one-hot columns are all-zero and the
    # pad rows never reach the output (and never mask out column 0 -> no NaN).
    u_pad = ((u + 7) // 8) * 8
    pad = u_pad - u
    if pad:
        Q_red = jnp.pad(Q_red, ((0, 0), (0, 0), (0, pad), (0, 0)))
        M_top_p = jnp.pad(M_top, ((0, 0), (0, 0), (0, pad)),
                          constant_values=L_Q)
    else:
        M_top_p = M_top
    idx_col = M_top_p[..., None]                                   # (B,H,u_pad,1)
    idx_row = M_top_p[:, :, None, :]                               # (B,H,1,u_pad)

    # ship MXU operands as bf16 (halves HBM/VMEM traffic for Q_red/K/V)
    q_bf = Q_red.astype(jnp.bfloat16)
    k_bf = K.astype(jnp.bfloat16)
    v_bf = V.astype(jnp.bfloat16)

    HP = _pick_head_group(H, D)        # heads per grid step
    G = H // HP                        # head groups

    kernel = functools.partial(_prob_attn_kernel, scale=scale_v, HP=HP)

    # scoped-VMEM sized from the actual double-buffered block footprint
    # (idx_col + idx_row i32, q/k/v/base/out bf16), clamped to a safe range.
    block_bytes = 2 * (HP * u_pad * 4 * 2
                       + HP * u_pad * D * 2
                       + 2 * HP * L_K * D * 2
                       + HP * L_Q * D * 2
                       + L_Q * HP * D * 2)
    vmem_limit = int(min(64 * 1024 * 1024, max(32 * 1024 * 1024, 3 * block_bytes)))

    out = pl.pallas_call(
        kernel,
        out_shape=jax.ShapeDtypeStruct((B, L_Q, H * D), jnp.bfloat16),
        grid=(B, G),
        in_specs=[
            pl.BlockSpec((1, HP, u_pad, 1), lambda b, g: (b, g, 0, 0)),
            pl.BlockSpec((1, HP, 1, u_pad), lambda b, g: (b, g, 0, 0)),
            pl.BlockSpec((1, HP, u_pad, D), lambda b, g: (b, g, 0, 0)),
            pl.BlockSpec((1, HP, L_K, D), lambda b, g: (b, g, 0, 0)),
            pl.BlockSpec((1, HP, L_K, D), lambda b, g: (b, g, 0, 0)),
            pl.BlockSpec((1, HP, L_Q, D), lambda b, g: (b, g, 0, 0)),
        ],
        out_specs=pl.BlockSpec((1, L_Q, HP * D), lambda b, g: (b, 0, g)),
        compiler_params=pltpu.CompilerParams(
            dimension_semantics=("parallel", "parallel"),
            vmem_limit_bytes=vmem_limit),
    )(idx_col, idx_row, q_bf, k_bf, v_bf, ctx_base)

    context = out.reshape(B, L_Q, H, D)                            # (B,L_Q,H,D) bf16
    return context, None, (Q, K, V, M_top, scale_v)


def _reference_context(Q, K, V, M_top, scale):
    """Pure-JAX f32 reference of the kernel stage (masked softmax + scatter)."""
    B, H, L, D = V.shape
    Q_red = jnp.take_along_axis(Q, M_top[..., None], axis=2)
    scores = jnp.einsum('bhud,bhkd->bhuk', Q_red, K) * scale
    col = jnp.arange(L)[None, None, None, :]
    scores = jnp.where(col > M_top[..., None], -jnp.inf, scores)
    attn = jax.nn.softmax(scores, axis=-1)
    ctx_sel = jnp.einsum('bhuk,bhkd->bhud', attn, V)
    ctx = jnp.cumsum(V, axis=2)
    ctx = ctx.at[jnp.arange(B)[:, None, None],
                 jnp.arange(H)[None, :, None],
                 M_top].set(ctx_sel)
    return jnp.transpose(ctx, (0, 2, 1, 3))


if __name__ == "__main__":
    B, L, H, D = 2, 16, 2, 32   # small shapes: batch=2, seq=16, heads=2, head_dim=32
    key = jax.random.PRNGKey(0)
    kq, kk, kv, ks = jax.random.split(key, 4)
    queries = jax.random.normal(kq, (B, L, H, D), jnp.float32)
    keys = jax.random.normal(kk, (B, L, H, D), jnp.float32)
    values = jax.random.normal(kv, (B, L, H, D), jnp.float32)

    context, attn, (Q, K, V, M_top, scale_v) = prob_attention(
        queries, keys, values, sample_key=ks)
    context = jax.block_until_ready(context)

    # sanity check against plain-JAX f32 reference (loose tol: bf16 streams/MXU)
    ref = jax.block_until_ready(_reference_context(Q, K, V, M_top, scale_v))
    np.testing.assert_allclose(np.asarray(context, dtype=np.float32),
                               np.asarray(ref, dtype=np.float32),
                               rtol=5e-2, atol=5e-2)
    assert context.shape == (B, L, H, D)
    assert attn is None
    print("KERNEL_OK")
</pallas_src>

<mosaic_0001>
module attributes {stable_mosaic.version = 11 : i64} {
  func.func @_prob_attn_kernel(%arg0: i32, %arg1: i32, %arg2: memref<1x2x16x1xi32, #tpu.memory_space<vmem>>, %arg3: memref<1x2x1x16xi32, #tpu.memory_space<vmem>>, %arg4: memref<1x2x16x32xbf16, #tpu.memory_space<vmem>>, %arg5: memref<1x2x16x32xbf16, #tpu.memory_space<vmem>>, %arg6: memref<1x2x16x32xbf16, #tpu.memory_space<vmem>>, %arg7: memref<1x2x16x32xbf16, #tpu.memory_space<vmem>>, %arg8: memref<1x16x64xbf16, #tpu.memory_space<vmem>>) attributes {dimension_semantics = [#tpu.dimension_semantics<parallel>, #tpu.dimension_semantics<parallel>], iteration_bounds = array<i64: 2, 1>, scalar_prefetch = 0 : i64, scratch_operands = 0 : i64, tpu.core_type = #tpu.core_type<tc>, window_params = [{transform_indices = @transform_0, window_bounds = array<i64: 1, 2, 16, 1>}, {transform_indices = @transform_1, window_bounds = array<i64: 1, 2, 1, 16>}, {transform_indices = @transform_2, window_bounds = array<i64: 1, 2, 16, 32>}, {transform_indices = @transform_3, window_bounds = array<i64: 1, 2, 16, 32>}, {transform_indices = @transform_4, window_bounds = array<i64: 1, 2, 16, 32>}, {transform_indices = @transform_5, window_bounds = array<i64: 1, 2, 16, 32>}, {transform_indices = @transform_6, window_bounds = array<i64: 1, 16, 64>}]} {
    %0 = tpu.iota {dimensions = array<i32: 1>} : vector<16x16xi32>
    %1 = tpu.iota {dimensions = array<i32: 0>} : vector<16x16xi32>
    %c0 = arith.constant 0 : index
    %c0_0 = arith.constant 0 : index
    %c0_1 = arith.constant 0 : index
    %c0_2 = arith.constant 0 : index
    %2 = vector.load %arg4[%c0, %c0_0, %c0_1, %c0_2] : memref<1x2x16x32xbf16, #tpu.memory_space<vmem>>, vector<1x1x16x32xbf16>
    %3 = vector.shape_cast %2 : vector<1x1x16x32xbf16> to vector<16x32xbf16>
    %c0_3 = arith.constant 0 : index
    %c0_4 = arith.constant 0 : index
    %c0_5 = arith.constant 0 : index
    %c0_6 = arith.constant 0 : index
    %4 = vector.load %arg5[%c0_3, %c0_4, %c0_5, %c0_6] : memref<1x2x16x32xbf16, #tpu.memory_space<vmem>>, vector<1x1x16x32xbf16>
    %5 = vector.shape_cast %4 : vector<1x1x16x32xbf16> to vector<16x32xbf16>
    %c0_7 = arith.constant 0 : index
    %c0_8 = arith.constant 0 : index
    %c0_9 = arith.constant 0 : index
    %c0_10 = arith.constant 0 : index
    %6 = vector.load %arg6[%c0_7, %c0_8, %c0_9, %c0_10] : memref<1x2x16x32xbf16, #tpu.memory_space<vmem>>, vector<1x1x16x32xbf16>
    %7 = vector.shape_cast %6 : vector<1x1x16x32xbf16> to vector<16x32xbf16>
    %c0_11 = arith.constant 0 : index
    %c0_12 = arith.constant 0 : index
    %c0_13 = arith.constant 0 : index
    %c0_14 = arith.constant 0 : index
    %8 = vector.load %arg7[%c0_11, %c0_12, %c0_13, %c0_14] : memref<1x2x16x32xbf16, #tpu.memory_space<vmem>>, vector<1x1x16x32xbf16>
    %9 = vector.shape_cast %8 : vector<1x1x16x32xbf16> to vector<16x32xbf16>
    %c0_15 = arith.constant 0 : index
    %c0_16 = arith.constant 0 : index
    %c0_17 = arith.constant 0 : index
    %c0_18 = arith.constant 0 : index
    %10 = vector.load %arg2[%c0_15, %c0_16, %c0_17, %c0_18] : memref<1x2x16x1xi32, #tpu.memory_space<vmem>>, vector<1x1x16x1xi32>
    %11 = vector.shape_cast %10 : vector<1x1x16x1xi32> to vector<16x1xi32>
    %c0_19 = arith.constant 0 : index
    %c0_20 = arith.constant 0 : index
    %c0_21 = arith.constant 0 : index
    %c0_22 = arith.constant 0 : index
    %12 = vector.load %arg3[%c0_19, %c0_20, %c0_21, %c0_22] : memref<1x2x1x16xi32, #tpu.memory_space<vmem>>, vector<1x1x1x16xi32>
    %13 = vector.shape_cast %12 : vector<1x1x1x16xi32> to vector<1x16xi32>
    %cst = arith.constant dense<0.000000e+00> : vector<16x16xf32>
    %14 = tpu.matmul %3, %5, %cst {dimension_numbers = #tpu.dot_dimension_numbers<[1], [1], [0], [0], [0, 0, 1, 0], [], []>} : vector<16x32xbf16>, vector<16x32xbf16>, vector<16x16xf32> -> vector<16x16xf32>
    %cst_23 = arith.constant 0.176776692 : f32
    %15 = vector.broadcast %cst_23 : f32 to vector<16x16xf32>
    %16 = arith.mulf %14, %15 : vector<16x16xf32>
    %17 = vector.broadcast %11 : vector<16x1xi32> to vector<16x16xi32>
    %18 = arith.cmpi sgt, %0, %17 : vector<16x16xi32>
    %cst_24 = arith.constant 0xFF800000 : f32
    %19 = vector.broadcast %cst_24 : f32 to vector<16x16xf32>
    %20 = arith.select %18, %19, %16 : vector<16x16xi1>, vector<16x16xf32>
    %cst_25 = arith.constant dense<0xFF800000> : vector<16xf32>
    %21 = vector.multi_reduction <maximumf>, %20, %cst_25 [1] : vector<16x16xf32> to vector<16xf32>
    %22 = vector.shape_cast %21 : vector<16xf32> to vector<16x1xf32>
    %23 = vector.broadcast %22 : vector<16x1xf32> to vector<16x16xf32>
    %24 = arith.subf %20, %23 : vector<16x16xf32>
    %25 = math.exp %24 : vector<16x16xf32>
    %cst_26 = arith.constant dense<0.000000e+00> : vector<16xf32>
    %26 = vector.multi_reduction <add>, %25, %cst_26 [1] : vector<16x16xf32> to vector<16xf32>
    %27 = vector.shape_cast %26 : vector<16xf32> to vector<16x1xf32>
    %28 = tpu.reciprocal %27 {approx = true} : vector<16x1xf32> -> vector<16x1xf32>
    %29 = vector.broadcast %28 : vector<16x1xf32> to vector<16x16xf32>
    %30 = arith.mulf %25, %29 : vector<16x16xf32>
    %31 = arith.truncf %30 : vector<16x16xf32> to vector<16x16xbf16>
    %cst_27 = arith.constant dense<0.000000e+00> : vector<16x32xf32>
    %32 = tpu.matmul %31, %7, %cst_27 {dimension_numbers = #tpu.dot_dimension_numbers<[1], [0], [0], [1], [0, 0, 1, 1], [], []>} : vector<16x16xbf16>, vector<16x32xbf16>, vector<16x32xf32> -> vector<16x32xf32>
    %33 = vector.broadcast %13 : vector<1x16xi32> to vector<16x16xi32>
    %34 = arith.cmpi eq, %1, %33 : vector<16x16xi32>
    %35 = arith.extui %34 : vector<16x16xi1> to vector<16x16xi32>
    %36 = arith.sitofp %35 : vector<16x16xi32> to vector<16x16xf32>
    %37 = arith.truncf %36 : vector<16x16xf32> to vector<16x16xbf16>
    %38 = arith.extui %34 : vector<16x16xi1> to vector<16x16xi32>
    %cst_28 = arith.constant dense<-2147483648> : vector<16xi32>
    %39 = vector.multi_reduction <maxsi>, %38, %cst_28 [1] : vector<16x16xi32> to vector<16xi32>
    %40 = vector.shape_cast %39 : vector<16xi32> to vector<16x1xi32>
    %c0_i32 = arith.constant 0 : i32
    %41 = vector.broadcast %c0_i32 : i32 to vector<16x1xi32>
    %42 = arith.cmpi sgt, %40, %41 : vector<16x1xi32>
    %43 = arith.truncf %32 : vector<16x32xf32> to vector<16x32xbf16>
    %cst_29 = arith.constant dense<0.000000e+00> : vector<16x32xf32>
    %44 = tpu.matmul %37, %43, %cst_29 {dimension_numbers = #tpu.dot_dimension_numbers<[1], [0], [0], [1], [0, 0, 1, 1], [], []>} : vector<16x16xbf16>, vector<16x32xbf16>, vector<16x32xf32> -> vector<16x32xf32>
    %45 = arith.truncf %44 : vector<16x32xf32> to vector<16x32xbf16>
    %46 = vector.shape_cast %42 : vector<16x1xi1> to vector<16x1xi1>
    %47 = vector.broadcast %46 : vector<16x1xi1> to vector<16x32xi1>
    %48 = arith.select %47, %45, %9 : vector<16x32xi1>, vector<16x32xbf16>
    %c0_30 = arith.constant 0 : index
    %c1 = arith.constant 1 : index
    %c0_31 = arith.constant 0 : index
    %c0_32 = arith.constant 0 : index
    %49 = vector.load %arg4[%c0_30, %c1, %c0_31, %c0_32] : memref<1x2x16x32xbf16, #tpu.memory_space<vmem>>, vector<1x1x16x32xbf16>
    %50 = vector.shape_cast %49 : vector<1x1x16x32xbf16> to vector<16x32xbf16>
    %c0_33 = arith.constant 0 : index
    %c1_34 = arith.constant 1 : index
    %c0_35 = arith.constant 0 : index
    %c0_36 = arith.constant 0 : index
    %51 = vector.load %arg5[%c0_33, %c1_34, %c0_35, %c0_36] : memref<1x2x16x32xbf16, #tpu.memory_space<vmem>>, vector<1x1x16x32xbf16>
    %52 = vector.shape_cast %51 : vector<1x1x16x32xbf16> to vector<16x32xbf16>
    %c0_37 = arith.constant 0 : index
    %c1_38 = arith.constant 1 : index
    %c0_39 = arith.constant 0 : index
    %c0_40 = arith.constant 0 : index
    %53 = vector.load %arg6[%c0_37, %c1_38, %c0_39, %c0_40] : memref<1x2x16x32xbf16, #tpu.memory_space<vmem>>, vector<1x1x16x32xbf16>
    %54 = vector.shape_cast %53 : vector<1x1x16x32xbf16> to vector<16x32xbf16>
    %c0_41 = arith.constant 0 : index
    %c1_42 = arith.constant 1 : index
    %c0_43 = arith.constant 0 : index
    %c0_44 = arith.constant 0 : index
    %55 = vector.load %arg7[%c0_41, %c1_42, %c0_43, %c0_44] : memref<1x2x16x32xbf16, #tpu.memory_space<vmem>>, vector<1x1x16x32xbf16>
    %56 = vector.shape_cast %55 : vector<1x1x16x32xbf16> to vector<16x32xbf16>
    %c0_45 = arith.constant 0 : index
    %c1_46 = arith.constant 1 : index
    %c0_47 = arith.constant 0 : index
    %c0_48 = arith.constant 0 : index
    %57 = vector.load %arg2[%c0_45, %c1_46, %c0_47, %c0_48] : memref<1x2x16x1xi32, #tpu.memory_space<vmem>>, vector<1x1x16x1xi32>
    %58 = vector.shape_cast %57 : vector<1x1x16x1xi32> to vector<16x1xi32>
    %c0_49 = arith.constant 0 : index
    %c1_50 = arith.constant 1 : index
    %c0_51 = arith.constant 0 : index
    %c0_52 = arith.constant 0 : index
    %59 = vector.load %arg3[%c0_49, %c1_50, %c0_51, %c0_52] : memref<1x2x1x16xi32, #tpu.memory_space<vmem>>, vector<1x1x1x16xi32>
    %60 = vector.shape_cast %59 : vector<1x1x1x16xi32> to vector<1x16xi32>
    %cst_53 = arith.constant dense<0.000000e+00> : vector<16x16xf32>
    %61 = tpu.matmul %50, %52, %cst_53 {dimension_numbers = #tpu.dot_dimension_numbers<[1], [1], [0], [0], [0, 0, 1, 0], [], []>} : vector<16x32xbf16>, vector<16x32xbf16>, vector<16x16xf32> -> vector<16x16xf32>
    %cst_54 = arith.constant 0.176776692 : f32
    %62 = vector.broadcast %cst_54 : f32 to vector<16x16xf32>
    %63 = arith.mulf %61, %62 : vector<16x16xf32>
    %64 = vector.broadcast %58 : vector<16x1xi32> to vector<16x16xi32>
    %65 = arith.cmpi sgt, %0, %64 : vector<16x16xi32>
    %cst_55 = arith.constant 0xFF800000 : f32
    %66 = vector.broadcast %cst_55 : f32 to vector<16x16xf32>
    %67 = arith.select %65, %66, %63 : vector<16x16xi1>, vector<16x16xf32>
    %cst_56 = arith.constant dense<0xFF800000> : vector<16xf32>
    %68 = vector.multi_reduction <maximumf>, %67, %cst_56 [1] : vector<16x16xf32> to vector<16xf32>
    %69 = vector.shape_cast %68 : vector<16xf32> to vector<16x1xf32>
    %70 = vector.broadcast %69 : vector<16x1xf32> to vector<16x16xf32>
    %71 = arith.subf %67, %70 : vector<16x16xf32>
    %72 = math.exp %71 : vector<16x16xf32>
    %cst_57 = arith.constant dense<0.000000e+00> : vector<16xf32>
    %73 = vector.multi_reduction <add>, %72, %cst_57 [1] : vector<16x16xf32> to vector<16xf32>
    %74 = vector.shape_cast %73 : vector<16xf32> to vector<16x1xf32>
    %75 = tpu.reciprocal %74 {approx = true} : vector<16x1xf32> -> vector<16x1xf32>
    %76 = vector.broadcast %75 : vector<16x1xf32> to vector<16x16xf32>
    %77 = arith.mulf %72, %76 : vector<16x16xf32>
    %78 = arith.truncf %77 : vector<16x16xf32> to vector<16x16xbf16>
    %cst_58 = arith.constant dense<0.000000e+00> : vector<16x32xf32>
    %79 = tpu.matmul %78, %54, %cst_58 {dimension_numbers = #tpu.dot_dimension_numbers<[1], [0], [0], [1], [0, 0, 1, 1], [], []>} : vector<16x16xbf16>, vector<16x32xbf16>, vector<16x32xf32> -> vector<16x32xf32>
    %80 = vector.broadcast %60 : vector<1x16xi32> to vector<16x16xi32>
    %81 = arith.cmpi eq, %1, %80 : vector<16x16xi32>
    %82 = arith.extui %81 : vector<16x16xi1> to vector<16x16xi32>
    %83 = arith.sitofp %82 : vector<16x16xi32> to vector<16x16xf32>
    %84 = arith.truncf %83 : vector<16x16xf32> to vector<16x16xbf16>
    %85 = arith.extui %81 : vector<16x16xi1> to vector<16x16xi32>
    %cst_59 = arith.constant dense<-2147483648> : vector<16xi32>
    %86 = vector.multi_reduction <maxsi>, %85, %cst_59 [1] : vector<16x16xi32> to vector<16xi32>
    %87 = vector.shape_cast %86 : vector<16xi32> to vector<16x1xi32>
    %c0_i32_60 = arith.constant 0 : i32
    %88 = vector.broadcast %c0_i32_60 : i32 to vector<16x1xi32>
    %89 = arith.cmpi sgt, %87, %88 : vector<16x1xi32>
    %90 = arith.truncf %79 : vector<16x32xf32> to vector<16x32xbf16>
    %cst_61 = arith.constant dense<0.000000e+00> : vector<16x32xf32>
    %91 = tpu.matmul %84, %90, %cst_61 {dimension_numbers = #tpu.dot_dimension_numbers<[1], [0], [0], [1], [0, 0, 1, 1], [], []>} : vector<16x16xbf16>, vector<16x32xbf16>, vector<16x32xf32> -> vector<16x32xf32>
    %92 = arith.truncf %91 : vector<16x32xf32> to vector<16x32xbf16>
    %93 = vector.shape_cast %89 : vector<16x1xi1> to vector<16x1xi1>
    %94 = vector.broadcast %93 : vector<16x1xi1> to vector<16x32xi1>
    %95 = arith.select %94, %92, %56 : vector<16x32xi1>, vector<16x32xbf16>
    %96 = tpu.concatenate %48, %95 in 1 : vector<16x32xbf16>, vector<16x32xbf16> -> vector<16x64xbf16>
    %c0_62 = arith.constant 0 : index
    %c0_63 = arith.constant 0 : index
    %c0_64 = arith.constant 0 : index
    %97 = vector.load %arg8[%c0_62, %c0_63, %c0_64] : memref<1x16x64xbf16, #tpu.memory_space<vmem>>, vector<1x16x64xbf16>
    %98 = vector.shape_cast %97 : vector<1x16x64xbf16> to vector<16x64xbf16>
    %99 = vector.shape_cast %96 : vector<16x64xbf16> to vector<1x16x64xbf16>
    tpu.vector_store %arg8[%c0_62, %c0_63, %c0_64], %99 {strides = array<i32>} : memref<1x16x64xbf16, #tpu.memory_space<vmem>>, vector<1x16x64xbf16>,
    return
  }
  func.func @transform_0(%arg0: i32, %arg1: i32) -> (i32, i32, i32, i32) {
    %c0_i32 = arith.constant 0 : i32
    %c0_i32_0 = arith.constant 0 : i32
    %c0_i32_1 = arith.constant 0 : i32
    return %arg0, %arg1, %c0_i32, %c0_i32_0 : i32, i32, i32, i32
  }
  func.func @transform_1(%arg0: i32, %arg1: i32) -> (i32, i32, i32, i32) {
    %c0_i32 = arith.constant 0 : i32
    %c0_i32_0 = arith.constant 0 : i32
    %c0_i32_1 = arith.constant 0 : i32
    return %arg0, %arg1, %c0_i32, %c0_i32_0 : i32, i32, i32, i32
  }
  func.func @transform_2(%arg0: i32, %arg1: i32) -> (i32, i32, i32, i32) {
    %c0_i32 = arith.constant 0 : i32
    %c0_i32_0 = arith.constant 0 : i32
    %c0_i32_1 = arith.constant 0 : i32
    return %arg0, %arg1, %c0_i32, %c0_i32_0 : i32, i32, i32, i32
  }
  func.func @transform_3(%arg0: i32, %arg1: i32) -> (i32, i32, i32, i32) {
    %c0_i32 = arith.constant 0 : i32
    %c0_i32_0 = arith.constant 0 : i32
    %c0_i32_1 = arith.constant 0 : i32
    return %arg0, %arg1, %c0_i32, %c0_i32_0 : i32, i32, i32, i32
  }
  func.func @transform_4(%arg0: i32, %arg1: i32) -> (i32, i32, i32, i32) {
    %c0_i32 = arith.constant 0 : i32
    %c0_i32_0 = arith.constant 0 : i32
    %c0_i32_1 = arith.constant 0 : i32
    return %arg0, %arg1, %c0_i32, %c0_i32_0 : i32, i32, i32, i32
  }
  func.func @transform_5(%arg0: i32, %arg1: i32) -> (i32, i32, i32, i32) {
    %c0_i32 = arith.constant 0 : i32
    %c0_i32_0 = arith.constant 0 : i32
    %c0_i32_1 = arith.constant 0 : i32
    return %arg0, %arg1, %c0_i32, %c0_i32_0 : i32, i32, i32, i32
  }
  func.func @transform_6(%arg0: i32, %arg1: i32) -> (i32, i32, i32) {
    %c0_i32 = arith.constant 0 : i32
    %c0_i32_0 = arith.constant 0 : i32
    return %arg0, %c0_i32, %arg1 : i32, i32, i32
  }
}

</mosaic_0001>

<bundles_post_ra>
// kernel: tpu_custom_call.1
= control target key start
LH: loop header
LB: loop body
LE: loop exit
PB: predicated region body
PF: predicated region fallthrough
CT: control target
= control target key end

     0   :  { %s1936_s0 = inlined_call_operand.vmem [shape: s32[2,2,16,1], index: 0, kind: input, shape index: {}]   ;;  %s1937_s1 = inlined_call_operand.vmem [shape: s32[2,2,1,16], index: 1, kind: input, shape index: {}]   ;;  %s1938_s2 = inlined_call_operand.vmem [shape: bf16[2,2,16,32], index: 2, kind: input, shape index: {}]   ;;  %s1939_s3 = inlined_call_operand.vmem [shape: bf16[2,2,16,32], index: 3, kind: input, shape index: {}]   ;;  %s1940_s4 = inlined_call_operand.hbm [shape: bf16[2,2,16,32], index: 4, kind: input, shape index: {}]   ;;  %s1941_s5 = inlined_call_operand.hbm [shape: bf16[2,2,16,32], index: 5, kind: input, shape index: {}]   ;;  %s1942_s6 = inlined_call_operand.hbm [shape: bf16[2,16,64], index: 6, kind: output, shape index: {}]  }
   0x1   :  { %1946 = sst [smem:[#allocation14_spill]] %s1940_s4 }
   0x2   :  { %11 = vsyncpa [#allocation3], 0 }
   0x3   :  { %13 = vsyncpa [#allocation3 + $0x1], 0 }
   0x4   :  { %14 = vsyncpa [#allocation6], 0 }
   0x5   :  { %16 = vsyncpa [#allocation6 + $0x1], 0 }
   0x6   :  { %17 = vsyncpa [#allocation4], 0 }
   0x7   :  { %19 = vsyncpa [#allocation4 + $0x1], 0  ;;  %s1649_s21 = smov 0   ;;  %s1651_s22 = smov 0  }
   0x8   :  { %s1653_s23 = smov 0   ;;  %s1655_s24 = smov 0  }
   0x9   :  { %s1657_s25 = smov 0   ;;  %s1659_s26 = smov 0  }
   0xa LB: > { %1947 = sst [smem:[#allocation11_spill]] %s1589_s23  ;;  %s1245_s27 = sadd.s32 4294967295, %s1601_s26   ;;  %s1601_s26 = sphi %s1659_s26, %s25_s26   ;;  %s1597_s25 = sphi %s1657_s25, %s1964_s25   ;;  %s1593_s24 = sphi %s1655_s24, %s1963_s24   ;;  %s1589_s23 = sphi %s1653_s23, %s1959_s23   ;;  %s1585_s22 = sphi %s1651_s22, %s1962_s22   ;;  %s1581_s21 = sphi %s1649_s21, %s1961_s21  }
   0xb   : > { %s1246_s28 = sadd.s32 4294967294, %s1601_s26   ;;  %s37_s29 = sadd.s32 1, %s1597_s25 }
   0xc   : > { %s158_s30 = sadd.s32 1, %s1589_s23  ;;  %p39_p0 = scmp.ge.s32.totalorder %s37_s29, 2 }
   0xd   : > { %p165_p1 = scmp.ne.s32.totalorder %s1589_s23, %s1585_s22  ;;  %p166_p2 = scmp.eq.s32.totalorder %s1601_s26, 0 }
   0xe   : > { %p171_p3 = scmp.ne.s32.totalorder %s1585_s22, %s1581_s21  ;;  %s1966_s29 = smov (%p39_p0, %s37_s29), 0 }
   0xf   : > { %1948 = sst [smem:[#allocation12_spill]] %s1966_s29  ;;  %p1690_p4 = por %p166_p2, %p165_p1 }
  0x10   : > { %p172_p5 = scmp.eq.s32.totalorder %s1245_s27, 0  ;;  %s153_s8 = ssub.s32 %s1597_s25, %s1966_s29 }
  0x11   : > { %p225_p6 = scmp.eq.s32.totalorder %s1245_s27, 1  ;;  %p156_p7 = scmp.eq.s32.totalorder %s153_s8, 0 }
  0x12   : > { %p1696_p8 = por %p172_p5, %p171_p3  ;;  %p231_p10 = scmp.eq.s32.totalorder %s1246_s28, 1 }
  0x13   : > { %p1700_p9 = por %p225_p6, %p165_p1  ;;  %p1248_p12 = scmp.ge.s32.totalorder %s1601_s26, 2 }
  0x14   : > { %s1705_s11 = scalar_select %p156_p7, %s1589_s23, %s158_s30  }
  0x15   : > { %p1707_p11 = por %p231_p10, %p171_p3  ;;  %p1377_p13 = scmp.lt.s32.totalorder %s1601_s26, 2 }
  0x16   : > { %1952 = sst [smem:[#allocation13_spill]] %s1705_s11  ;;  %s1714_s13 = sand.u32 1, %s1589_s23  }
  0x17   : > { %s1943_s14 = sshll.u32 %s1714_s13, 4  ;;  %s1306_s15 = sshll.u32 %s1597_s25, 8 }
  0x18   : > { %s1954_s4 = sld [smem:[#allocation14_spill]]  ;;  %s309_s19 = scalar_lea.vmem [#allocation2], %s1943_s14 }
  0x19   : > { %s319_s20 = sshll.u32 %s309_s19, 4  ;;  %p1727_p0 = pnand %p1377_p13, %p1690_p4  ;;  %s320_s20 = int_to_ptr.vmem [resolvable:$true] %s319_s20 }
  0x1a   : > { %p1255_p1 = scmp.ge.s32.totalorder %s1601_s26, 1  ;;  %s306_s28 = scalar_lea.sflag [#allocation3], %s1714_s13 }
  0x1b   : > { %p1463_p2 = pneg %p1727_p0  ;;  %s1474_s30 = scalar_lea.vmem %s320_s20, 256 }
  0x1c   : > { %p1475_p3 = scmp.ne.s32.totalorder %s320_s20, %s1474_s30  ;;  %s1603_s8 = smov [#allocation2]  }
  0x1d   : > { %s1479_s16 = sshll.u32 %s1603_s8, 4  ;;  %s1480_s16 = int_to_ptr.vmem [resolvable:$false] %s1479_s16 }
  0x1e   : > { %s318_s18 = scalar_lea.hbm %s1954_s4, %s1306_s15  ;;  %p1477_p5 = pnand %p1475_p3, %p1463_p2 }
  0x1f   : > { %s1481_s7 = scalar_lea.vmem %s1480_s16, 512  ;;  %p1482_p4 = scmp.lt.s32.totalorder %s320_s20, %s1480_s16 }
  0x20   : > { %p1478_p6 = pneg %p1477_p5  ;;  %p1483_p7 = scmp.lt.s32.totalorder %s1481_s7, %s1474_s30 }
  0x22   : > { %p1484_p10 = por %p1483_p7, %p1482_p4 }
  0x24   : > { %p1485_p13 = pnand %p1484_p10, %p1478_p6 }
  0x26   : > { %1488 = shalt.err (!%p1485_p13)
}
  0x27   : > { %s1604_s17 = smov 64   ;;  %s1605_s19 = smov 4  }
  0x28   : > { %1369 = dma.hbm_to_vmem [thread:$0]  (!%p1727_p0), %s318_s18, 256, %s320_s20, %s306_s28, %s1604_s17, %s1604_s17, %s1605_s19  }
  0x29   : > { %p351_p3 = scmp.lt.s32.totalorder %s1601_s26, 3  ;;  %s342_s30 = scalar_lea.hbm %s1941_s5, %s1306_s15 }
  0x2a   : > { %s1957_s7 = sshll.u32 %s1714_s13, 4  ;;  %s330_s11 = scalar_lea.sflag [#allocation6], %s1714_s13 }
  0x2b   : > { %p1748_p5 = pnand %p1255_p1, %p351_p3  ;;  %s333_s4 = scalar_lea.vmem [#allocation5], %s1957_s7 }
  0x2c   : > { %s343_s29 = sshll.u32 %s333_s4, 4  ;;  %s1606_s18 = smov [#allocation5]   ;;  %s344_s29 = int_to_ptr.vmem [resolvable:$true] %s343_s29 }
  0x2d   : > { %s1502_s23 = scalar_lea.vmem %s344_s29, 256  ;;  %s1507_s20 = sshll.u32 %s1606_s18, 4  ;;  %s1508_s20 = int_to_ptr.vmem [resolvable:$false] %s1507_s20 }
  0x2e   : > { %p1503_p6 = scmp.ne.s32.totalorder %s344_s29, %s1502_s23  ;;  %s1509_s14 = scalar_lea.vmem %s1508_s20, 512 }
  0x2f   : > { %p1510_p10 = scmp.lt.s32.totalorder %s344_s29, %s1508_s20  ;;  %p1511_p1 = scmp.lt.s32.totalorder %s1509_s14, %s1502_s23 }
  0x30   : > { %p1505_p4 = pnand %p1503_p6, %p1463_p2 }
  0x31   : > { %p1512_p13 = por %p1511_p1, %p1510_p10 }
  0x32   : > { %p1506_p7 = pneg %p1505_p4 }
  0x34   : > { %p1513_p3 = pnand %p1512_p13, %p1506_p7 }
  0x36   : > { %1516 = shalt.err (!%p1513_p3)
}
  0x37   : > { %1372 = dma.hbm_to_vmem [thread:$0]  (!%p1727_p0), %s342_s30, 256, %s344_s29, %s330_s11, %s1604_s17, %s1604_s17, %s1605_s19  }
  0x38   : > { %355 = sbr.rel (%p1748_p5) target bundleno = 1433 (0x599), region = 44  ;;  %s1763_s4 = sand.u32 (!%p1748_p5), 1, %s1585_s22  }
  0x39   : > { %s1256_s13 = sshll.u32 (!%p1748_p5), %s1763_s4, 4  ;;  %s358_s15 = scalar_lea.sflag (!%p1748_p5), [#allocation3], %s1763_s4 }
  0x3a   : > { %s1767_s28 = scalar_lea.vmem (!%p1748_p5), [#allocation2], %s1256_s13 }
  0x3d   : > { %1568 = dma.done.wait (%p1696_p8), %s358_s15, 256  }
  0x3e   : > { %1570 = vsyncadd (%p1696_p8), %s358_s15, 4294967040  ;;  %s367_s23 = scalar_lea.sflag [#allocation6], %s1763_s4  ;;  %s1774_s29 = scalar_lea.vmem [#allocation5], %s1256_s13 }
  0x3f   : > { %1572 = dma.done.wait (%p1696_p8), %s367_s23, 256  }
  0x40   : > { %1574 = vsyncadd (%p1696_p8), %s367_s23, 4294967040  ;;  %p443_p0 = scmp.lt.s32.totalorder %s1593_s24, 1  ;;  %v1607_v0 = vmov 0.0   ;;  %vm1608_vm0 = vmmov 0   ;;  %v1609_v1 = vmov 0   ;;  %vm515_vm1 = vcmask 261120  }
  0x41   : > { %1324 = vmatprep.subr.bf16.mxu0 %v1607_v0  ;;  %1326 = vmatprep.mubr.msk.bf16.mxu0 %vm1608_vm0, %v1607_v0  ;;  %v489_v10 = vlaneseq  ;;  %vm575_vm3 = vcmask 130048   ;;  %v1441_v40 = vld [vmem:[%s1767_s28] sm:$0xff]  }
  0x42   : > { %s1785_s11 = scalar_select %p443_p0, %s1593_s24, 1  ;;  %1435 = vset.pattern.permute.xlu0 %v1609_v1  ;;  %1436 = vset.pattern.permute.xlu1 %v1609_v1 }
  0x43   : > { %1330 = vmatprep.subr.bf16.mxu1 %v1607_v0  ;;  %1332 = vmatprep.mubr.msk.bf16.mxu1 %vm1608_vm0, %v1607_v0  ;;  %v490_v11 = vand.u32 127, %v489_v10  ;;  %v492_v56 = vshrl.u32 %v489_v10, 7 }
  0x44   : > { %s1309_s9 = sshll.u32 %s1785_s11, 4  ;;  %s1308_s27 = sshll.u32 %s1785_s11, 5  ;;  %1331 = vmatpush3.bf16.msra.mxu1 %v1441_v40 }
  0x45   : > { %s482_s8 = scalar_lea.vmem %s1939_s3, %s1309_s9  ;;  %s1800_s7 = scalar_lea.vmem %s1936_s0, %s1308_s27  ;;  %1336 = vmatprep.subr.bf16.mxu1 %v1607_v0  ;;  %v493_v58 = vadd.s32 8, %v492_v56 }
  0x46   : > { %s471_s14 = scalar_lea.vmem %s1938_s2, %s1309_s9  ;;  %v1437_v2 = vld [vmem:[%s482_s8] sm:$0xff]   ;;  %v503_v5 = vld [vmem:[%s1800_s7 + $0x8] sm:$0xff]  ;;  %v1285_v38 = vld [vmem:[%s1800_s7 + $0x10] sm:$0xff]  ;;  %s1261_s13 = sshll.u32 %s1785_s11, 1 }
  0x47   : > { %v520_v3 = vsel %vm515_vm1, %v1437_v2, 0  ;;  %v502_v4 = vld [vmem:[%s1800_s7] sm:$0xff]  ;;  %v1439_v7 = vld [vmem:[%s482_s8 + $0x8] sm:$0xff]   ;;  %v1286_v39 = vld [vmem:[%s1800_s7 + $0x18] sm:$0xff]  ;;  %s460_s9 = scalar_lea.vmem %s1937_s1, %s1261_s13  ;;  %s1258_s11 = sshll.u32 %s1763_s4, 3 }
  0x48   : > { %1325 = vmatpush3.bf16.xpose.msra.mxu0 %v520_v3  ;;  %566 = vperm.xlu0 %1435, %v502_v4   ;;  %v1438_v6 = vld [vmem:[%s471_s14] sm:$0xff]   ;;  %v788_v8 = vsel %vm515_vm1, %v1439_v7, 0  ;;  %v1440_v9 = vld [vmem:[%s471_s14 + $0x8] sm:$0xff]   ;;  %s1311_s27 = sshll.u32 %s1593_s24, 7  ;;  %s441_s17 = scalar_lea.vmem [#allocation7], %s1258_s11 }
  0x49   : > { %1342 = vmatprep.subr.bf16.mxu0 %v1607_v0  ;;  %v1293_v57 = vld [vmem:[%s460_s9 + $0x1] ss:$0 sm:$0xff]  ;;  %v1271_v7 = vld [vmem:[%s460_s9] ss:$0 sm:$0xff]  ;;  %s1055_s19 = sshll.u32 %s441_s17, 4  ;;  %s1041_s24 = scalar_lea.sflag [#allocation4], %s1763_s4  ;;  %s1888_s19 = int_to_ptr.vmem [resolvable:$true] %s1055_s19 }
  0x4a   : > { %vm920_vm7 = vcmp.eq.s32.totalorder %v492_v56, %v1293_v57  ;;  %vm921_vm8 = vcmp.eq.s32.totalorder %v493_v58, %v1293_v57  ;;  %vm653_vm9 = vcmp.eq.s32.totalorder %v492_v56, %v1271_v7  ;;  %vm654_vm10 = vcmp.eq.s32.totalorder %v493_v58, %v1271_v7  ;;  %s1517_s16 = scalar_lea.vmem %s1888_s19, 128  ;;  %s1611_s7 = smov [#allocation7]  }
  0x4b   : > { %v1837_v59 = vsel %vm920_vm7, 1.0, %v1607_v0  ;;  %v1840_v60 = vsel %vm921_vm8, 1.0, %v1607_v0  ;;  %v923_v10 = vsel %vm921_vm8, 1, %v1609_v1  ;;  %p1518_p8 = scmp.ne.s32.totalorder %s1888_s19, %s1517_s16  ;;  %s1521_s18 = sshll.u32 %s1611_s7, 4  ;;  %s1522_s18 = int_to_ptr.vmem [resolvable:$false] %s1521_s18 }
  0x4c   : > { %569 = vperm.xlu0 %1435, %v503_v5   ;;  %v926_v61 = vpack.c.bf16 %v1840_v60, %v1837_v59  ;;  %s1523_s20 = scalar_lea.vmem %s1522_s18, 256  ;;  %p1524_p6 = scmp.lt.s32.totalorder %s1888_s19, %s1522_s18 }
  0x4d   : > { %p1519_p2 = pnand %p1518_p8, %p1700_p9  ;;  %p1525_p4 = scmp.lt.s32.totalorder %s1523_s20, %s1517_s16 }
  0x4f   : > { %1327 = vmatmul.mubr.msk.bf16.vlgmr.msra.gmra.mxu0 %vm515_vm1, %v1438_v6  ;;  %v922_v6 = vsel %vm920_vm7, 1, %v1609_v1  ;;  %p1520_p5 = pneg %p1519_p2  ;;  %p1526_p7 = por %p1525_p4, %p1524_p6 }
  0x50   : > { %1344 = vmatprep.mubr.msk.bf16.mxu0 %vm1608_vm0, %v1607_v0  ;;  %1343 = vmatpush3.bf16.xpose.msra.mxu0 %v788_v8  ;;  %v927_v8 = vsel %vm575_vm3, %v922_v6, 2147483648 }
  0x51   : > { %1354 = vmatprep.subr.bf16.mxu0 %v1607_v0  ;;  %p1527_p10 = pnand %p1526_p7, %p1520_p5 }
  0x57   : > { %1345 = vmatmul.mubr.msk.bf16.vlgmr.msra.gmra.mxu0 %vm515_vm1, %v1440_v9 }
  0x58   : > { %1356 = vmatprep.mubr.msk.bf16.mxu0 %vm1608_vm0, %v1607_v0 }
  0xc3   : > { %v567_v12 = vpop.permute.xlu0 %566 }
  0xc4   : > { %vm571_vm2 = vcmp.gt.s32.totalorder %v490_v11, %v567_v12  ;;  %v929_v12 = vshra.s32 %v927_v8, 16 }
  0xc7   : > { %v570_v16 = vpop.permute.xlu0 %569 }
  0xc8   : > { %vm572_vm4 = vcmp.gt.s32.totalorder %v490_v11, %v570_v16 }
 0x10f   : > { %v556_v13 = vpop.f32.mrf.mxu0 }
 0x110   : > { %v563_v14 = vmul.f32 0.17677669, %v556_v13  ;;  %v942_v13 = vsel %vm575_vm3, %v923_v10, 2147483648 }
 0x111   : > { %v1328_v15 = vpop.f32.mrf.mxu0  ;;  %v943_v40 = vand.u32 65535, %v942_v13 }
 0x112   : > { %v573_v17 = vsel %vm571_vm2, -inf, %v563_v14  ;;  %v655_v15 = vsel %vm653_vm9, 1, %v1609_v1 }
 0x113   : > { %v559_v18 = vpop.f32.mrf.mxu0  ;;  %v576_v19 = vsel %vm575_vm3, %v573_v17, -inf }
 0x114   : > { %v564_v20 = vmul.f32 0.17677669, %v559_v18  ;;  %577 = vmax.xlane.f32.xlu1 %v576_v19  ;;  %v944_v18 = vshra.s32 %v942_v13, 16  ;;  %v660_v19 = vsel %vm575_vm3, %v655_v15, 2147483648 }
 0x115   : > { %v1329_v21 = vpop.f32.mrf.mxu0 }
 0x116   : > { %v574_v22 = vsel %vm572_vm4, -inf, %v564_v20  ;;  %v656_v20 = vsel %vm654_vm10, 1, %v1609_v1  ;;  %v946_v21 = vcvt.s32.f32 %v944_v18 }
 0x117   : > { %v579_v23 = vsel %vm575_vm3, %v574_v22, -inf  ;;  %v824_v34 = vpop.f32.mrf.mxu0 }
 0x118   : > { %580 = vmax.xlane.f32.xlu1 %v579_v23  ;;  %v831_v43 = vmul.f32 0.17677669, %v824_v34  ;;  %v675_v23 = vsel %vm575_vm3, %v656_v20, 2147483648 }
 0x119   : > { %v1346_v35 = vpop.f32.mrf.mxu0 }
 0x11a   : > { %v1442_v35 = vld [vmem:[%s1767_s28 + $0x8] sm:$0xff]   ;;  %s1610_s28 = smov 32  }
 0x11b   : > { %v827_v36 = vpop.f32.mrf.mxu0 }
 0x11c   : > { %v832_v47 = vmul.f32 0.17677669, %v827_v36 }
 0x11d   : > { %v1347_v37 = vpop.f32.mrf.mxu0 }
 0x11e   : > { %v928_v37 = vand.u32 65535, %v927_v8 }
 0x19d   : > { %v578_v24 = vpop.xlane.xlu1 %577 }
 0x19e   : > { %v582_v25 = vsub.f32 %v573_v17, %v578_v24  ;;  %v931_v17 = vcvt.s32.f32 %v929_v12 }
 0x1a0   : > { %v584_v26 = vmul.f32 1.442695, %v582_v25  ;;  %v677_v25 = vshra.s32 %v675_v23, 16 }
 0x1a1   : > { %v581_v27 = vpop.xlane.xlu1 %580 }
 0x1a2   : > { %1445 = vpow2.f32 %v584_v26  ;;  %v583_v28 = vsub.f32 %v574_v22, %v581_v27  ;;  %v662_v22 = vshra.s32 %v660_v19, 16  ;;  %v679_v26 = vcvt.s32.f32 %v677_v25 }
 0x1a4   : > { %v586_v29 = vmul.f32 1.442695, %v583_v28  ;;  %v664_v24 = vcvt.s32.f32 %v662_v22 }
 0x1a6   : > { %1447 = vpow2.f32 %v586_v29  ;;  %v1272_v29 = vsel %vm653_vm9, 1.0, %v1607_v0 }
 0x1af   : > { %v1446_v30 = vpop.eup %1445 }
 0x1b0   : > { %v588_v31 = vsel %vm575_vm3, %v1446_v30, 0.0 }
 0x1b1   : > { %589 = vadd.xlane.f32.xlu0 %v588_v31 }
 0x1b3   : > { %v1448_v32 = vpop.eup %1447 }
 0x1b4   : > { %v591_v33 = vsel %vm575_vm3, %v1448_v32, 0.0 }
 0x1b5   : > { %592 = vadd.xlane.f32.xlu1 %v591_v33 }
 0x1c6   : > { %834 = vperm.xlu1 %1436, %v1285_v38  }
 0x1ca   : > { %837 = vperm.xlu1 %1436, %v1286_v39   ;;  %v930_v39 = vcvt.s32.f32 %v928_v37 }
 0x23a   : > { %v590_v41 = vpop.xlane.xlu0 %589 }
 0x23b   : > { %1449 = vrcp.f32 %v590_v41 }
 0x23e   : > { %v593_v42 = vpop.xlane.xlu1 %592 }
 0x23f   : > { %1451 = vrcp.f32 %v593_v42 }
 0x242   : > { %v835_v44 = vpop.permute.xlu1 %834 }
 0x243   : > { %vm839_vm5 = vcmp.gt.s32.totalorder %v490_v11, %v835_v44  ;;  %v661_v44 = vand.u32 65535, %v660_v19 }
 0x244   : > { %v841_v45 = vsel %vm839_vm5, -inf, %v831_v43  ;;  %v945_v43 = vcvt.s32.f32 %v943_v40 }
 0x245   : > { %v843_v46 = vsel %vm575_vm3, %v841_v45, -inf }
 0x246   : > { %v838_v48 = vpop.permute.xlu1 %837  ;;  %844 = vmax.xlane.f32.xlu1 %v843_v46 }
 0x247   : > { %vm840_vm6 = vcmp.gt.s32.totalorder %v490_v11, %v838_v48  ;;  %v676_v48 = vand.u32 65535, %v675_v23 }
 0x248   : > { %v842_v49 = vsel %vm840_vm6, -inf, %v832_v47  ;;  %v1450_v51 = vpop.eup %1449  ;;  %v663_v47 = vcvt.s32.f32 %v661_v44 }
 0x249   : > { %v846_v50 = vsel %vm575_vm3, %v842_v49, -inf  ;;  %v596_v53 = vmul.f32 %v1450_v51, %v1446_v30  ;;  %v1273_v30 = vsel %vm654_vm10, 1.0, %v1607_v0 }
 0x24a   : > { %847 = vmax.xlane.f32.xlu0 %v846_v50  ;;  %v659_v34 = vpack.c.bf16 %v1273_v30, %v1272_v29  ;;  %v1444_v29 = vld [vmem:[%s1774_s29] sm:$0xff]  }
 0x24c   : > { %v1452_v52 = vpop.eup %1451 }
 0x24d   : > { %v597_v54 = vmul.f32 %v1452_v52, %v1448_v32  ;;  %v678_v52 = vcvt.s32.f32 %v676_v48 }
 0x24f   : > { %v598_v55 = vpack.c.bf16 %v597_v54, %v596_v53 }
 0x251   : > { %1333 = vmatmul.mubr.msk.bf16.vlgmr.msra.gmra.mxu1 %vm575_vm3, %v598_v55 }
 0x252   : > { %1338 = vmatprep.mubr.msk.bf16.mxu1 %vm1608_vm0, %v1607_v0 }
 0x2cf   : > { %v845_v62 = vpop.xlane.xlu1 %844 }
 0x2d0   : > { %v849_v63 = vsub.f32 %v841_v45, %v845_v62 }
 0x2d2   : > { %v851_v2 = vmul.f32 1.442695, %v849_v63 }
 0x2d3   : > { %v848_v3 = vpop.xlane.xlu0 %847 }
 0x2d4   : > { %1453 = vpow2.f32 %v851_v2  ;;  %v850_v4 = vsub.f32 %v842_v49, %v848_v3 }
 0x2d6   : > { %v853_v5 = vmul.f32 1.442695, %v850_v4 }
 0x2d8   : > { %1455 = vpow2.f32 %v853_v5 }
 0x2e1   : > { %v1846_v9 = vpop.eup %1453 }
 0x2e2   : > { %v855_v11 = vsel %vm575_vm3, %v1846_v9, 0.0 }
 0x2e3   : > { %856 = vadd.xlane.f32.xlu0 %v855_v11 }
 0x2e5   : > { %v1456_v14 = vpop.eup %1455 }
 0x2e6   : > { %v858_v16 = vsel %vm575_vm3, %v1456_v14, 0.0 }
 0x2e7   : > { %859 = vadd.xlane.f32.xlu0 %v858_v16 }
 0x2eb   : > { %932 = vmax.xlane.f32.xlu0 %v931_v17 }
 0x2ef   : > { %947 = vmax.xlane.f32.xlu0 %v946_v21 }
 0x2f3   : > { %665 = vmax.xlane.f32.xlu0 %v664_v24 }
 0x2f7   : > { %680 = vmax.xlane.f32.xlu0 %v679_v26 }
 0x311   : > { %v642_v27 = vpop.f32.mrf.mxu1 }
 0x313   : > { %v1334_v28 = vpop.f32.mrf.mxu1 }
 0x315   : > { %v645_v31 = vpop.f32.mrf.mxu1 }
 0x316   : > { %v692_v32 = vpack.c.bf16 %v645_v31, %v642_v27 }
 0x317   : > { %v1335_v33 = vpop.f32.mrf.mxu1 }
 0x318   : > { %1337 = vmatpush3.bf16.msra.mxu1 %v692_v32 }
 0x319   : > { %1348 = vmatprep.subr.bf16.mxu1 %v1607_v0 }
 0x31b   : > { %1339 = vmatmul.mubr.msk.bf16.vlgmr.msra.gmra.mxu1 %vm575_vm3, %v659_v34 }
 0x31c   : > { %1349 = vmatpush3.bf16.msra.mxu1 %v1442_v35  ;;  %1350 = vmatprep.mubr.msk.bf16.mxu1 %vm1608_vm0, %v1607_v0 }
 0x36c   : > { %v857_v36 = vpop.xlane.xlu0 %856 }
 0x36d   : > { %1457 = vrcp.f32 %v857_v36 }
 0x370   : > { %v860_v38 = vpop.xlane.xlu0 %859 }
 0x371   : > { %1459 = vrcp.f32 %v860_v38 }
 0x374   : > { %v933_v41 = vpop.xlane.xlu0 %932 }
 0x375   : > { %vm934_vm11 = vcmp.eq.f32.partialorder %v931_v17, %v933_v41  ;;  %v939_v4 = vcvt.f32.s32 %v933_v41 }
 0x376   : > { %v935_v42 = vsel %vm934_vm11, %v930_v39, -inf  ;;  %vm1037_vm11 = vcmask 519168  }
 0x377   : > { %936 = vmax.xlane.f32.xlu0 %v935_v42  ;;  %v940_v5 = vshll.u32 %v939_v4, 16 }
 0x378   : > { %v948_v45 = vpop.xlane.xlu0 %947 }
 0x379   : > { %vm949_vm12 = vcmp.eq.f32.partialorder %v946_v21, %v948_v45  ;;  %v954_v6 = vcvt.f32.s32 %v948_v45 }
 0x37a   : > { %v950_v46 = vsel %vm949_vm12, %v945_v43, -inf  ;;  %v1458_v0 = vpop.eup %1457 }
 0x37b   : > { %951 = vmax.xlane.f32.xlu1 %v950_v46  ;;  %v863_v53 = vmul.f32 %v1458_v0, %v1846_v9  ;;  %v955_v9 = vshll.u32 %v954_v6, 16 }
 0x37c   : > { %v666_v49 = vpop.xlane.xlu0 %665 }
 0x37d   : > { %vm667_vm13 = vcmp.eq.f32.partialorder %v664_v24, %v666_v49  ;;  %v672_v10 = vcvt.f32.s32 %v666_v49 }
 0x37e   : > { %v1460_v50 = vpop.eup %1459  ;;  %v668_v51 = vsel %vm667_vm13, %v663_v47, -inf }
 0x37f   : > { %v864_v54 = vmul.f32 %v1460_v50, %v1456_v14  ;;  %669 = vmax.xlane.f32.xlu0 %v668_v51  ;;  %v673_v14 = vshll.u32 %v672_v10, 16 }
 0x380   : > { %v681_v55 = vpop.xlane.xlu0 %680 }
 0x381   : > { %v865_v56 = vpack.c.bf16 %v864_v54, %v863_v53  ;;  %vm682_vm14 = vcmp.eq.f32.partialorder %v679_v26, %v681_v55  ;;  %v687_v15 = vcvt.f32.s32 %v681_v55 }
 0x382   : > { %v683_v57 = vsel %vm682_vm14, %v678_v52, -inf }
 0x383   : > { %1351 = vmatmul.mubr.msk.bf16.vlgmr.msra.gmra.mxu1 %vm575_vm3, %v865_v56  ;;  %684 = vmax.xlane.f32.xlu1 %v683_v57  ;;  %v688_v20 = vshll.u32 %v687_v15, 16 }
 0x3db   : > { %v730_v58 = vpop.f32.mrf.mxu1 }
 0x3dd   : > { %v1340_v62 = vpop.f32.mrf.mxu1 }
 0x3df   : > { %v733_v63 = vpop.f32.mrf.mxu1 }
 0x3e0   : > { %v737_v2 = vpack.c.bf16 %v733_v63, %v730_v58 }
 0x3e1   : > { %v1341_v3 = vpop.f32.mrf.mxu1 }
 0x400   : > { %v937_v7 = vpop.xlane.xlu0 %936 }
 0x401   : > { %v938_v8 = vcvt.f32.s32 %v937_v7 }
 0x403   : > { %v941_v11 = vadd.s32 %v940_v5, %v938_v8 }
 0x404   : > { %v952_v12 = vpop.xlane.xlu1 %951 }
 0x405   : > { %v953_v13 = vcvt.f32.s32 %v952_v12  ;;  %vm957_vm15 = vcmp.gt.s32.totalorder %v941_v11, 0 }
 0x406   : > { %vm1009_vm0 = vmpackc.low %vm957_vm15, %vm957_vm15 }
 0x407   : > { %v956_v16 = vadd.s32 %v955_v9, %v953_v13  ;;  %v1011_v18 = vsel %vm1009_vm0, 65537, %v1609_v1 }
 0x408   : > { %v670_v17 = vpop.xlane.xlu0 %669 }
 0x409   : > { %vm958_vm2 = vcmp.gt.s32.totalorder %v956_v16, 0  ;;  %v671_v19 = vcvt.f32.s32 %v670_v17 }
 0x40a   : > { %vm1010_vm4 = vmpackc.low %vm958_vm2, %vm958_vm2 }
 0x40b   : > { %v1012_v21 = vsel %vm1010_vm4, 65537, %v1609_v1  ;;  %v674_v22 = vadd.s32 %v673_v14, %v671_v19 }
 0x40c   : > { %v685_v23 = vpop.xlane.xlu1 %684  ;;  %v1297_v24 = vcombine.low %v1011_v18, %v1012_v21 }
 0x40d   : > { %v686_v25 = vcvt.f32.s32 %v685_v23  ;;  %vm690_vm5 = vcmp.gt.s32.totalorder %v674_v22, 0 }
 0x40e   : > { %vm742_vm6 = vmpackc.low %vm690_vm5, %vm690_vm5  ;;  %vm1016_vm10 = vcmp.ne.s16.totalorder %v1297_v24, 0 }
 0x40f   : > { %v689_v26 = vadd.s32 %v688_v20, %v686_v25  ;;  %v744_v27 = vsel %vm742_vm6, 65537, %v1609_v1 }
 0x411   : > { %vm691_vm7 = vcmp.gt.s32.totalorder %v689_v26, 0 }
 0x412   : > { %vm743_vm8 = vmpackc.low %vm691_vm7, %vm691_vm7 }
 0x413   : > { %v745_v28 = vsel %vm743_vm8, 65537, %v1609_v1  ;;  %v1443_v1 = vld [vmem:[%s1774_s29 + $0x8] sm:$0xff]   ;;  %s1886_s29 = scalar_lea.hbm %s1942_s6, %s1311_s27 }
 0x414   : > { %v1275_v30 = vcombine.low %v744_v27, %v745_v28 }
 0x416   : > { %vm749_vm9 = vcmp.ne.s16.totalorder %v1275_v30, 0 }
 0x417   : > { %v756_v31 = vsel %vm749_vm9, %v737_v2, %v1444_v29 }
 0x443   : > { %v909_v32 = vpop.f32.mrf.mxu1 }
 0x445   : > { %v1352_v33 = vpop.f32.mrf.mxu1 }
 0x447   : > { %v912_v34 = vpop.f32.mrf.mxu1 }
 0x448   : > { %v959_v35 = vpack.c.bf16 %v912_v34, %v909_v32 }
 0x449   : > { %v1353_v36 = vpop.f32.mrf.mxu1 }
 0x44a   : > { %1355 = vmatpush3.bf16.msra.mxu0 %v959_v35 }
 0x44d   : > { %1357 = vmatmul.mubr.msk.bf16.vlgmr.msra.gmra.mxu0 %vm575_vm3, %v926_v61 }
 0x50d   : > { %v997_v37 = vpop.f32.mrf.mxu0 }
 0x50f   : > { %v1358_v38 = vpop.f32.mrf.mxu0 }
 0x511   : > { %v1000_v39 = vpop.f32.mrf.mxu0 }
 0x512   : > { %v1004_v40 = vpack.c.bf16 %v1000_v39, %v997_v37 }
 0x513   : > { %v1359_v41 = vpop.f32.mrf.mxu0 }
 0x514   : > { %v1023_v42 = vsel %vm1016_vm10, %v1004_v40, %v1443_v1 }
 0x515   : > { %1025 = vrot.lane.b32.xlu0 %v1023_v42, %s1610_s28 }
 0x587   : > { %v1026_v43 = vpop.permute.xlu0 %1025 }
 0x588   : > { %v1029_v59 = vsel %vm515_vm1, %v756_v31, %v1026_v43 }
 0x589   : > { %v1299_v60 = vcombine.low %v1029_v59, %v1029_v59  ;;  %v1300_v61 = vcombine.high %v1029_v59, %v1029_v59 }
 0x58b   : > { %1038 = vst.msk [vmem:[%s441_s17] sm:$0xf] %vm1037_vm11, %v1299_v60  ;;  %1039 = vst.msk [vmem:[%s441_s17 + $0x4] sm:$0xf] %vm1037_vm11, %v1300_v61 }
 0x58c   : > { %1530 = shalt.err (!%p1527_p10)
}
 0x58d   : > { %s1531_s14 = scalar_lea.hbm %s1886_s29, 128  ;;  %s1535_s23 = scalar_lea.hbm %s1942_s6, 256 }
 0x58e   : > { %p1532_p1 = scmp.ne.s32.totalorder %s1886_s29, %s1531_s14  ;;  %p1536_p0 = scmp.lt.s32.totalorder %s1886_s29, %s1942_s6 }
 0x58f   : > { %p1537_p8 = scmp.lt.s32.totalorder %s1535_s23, %s1531_s14 }
 0x590   : > { %p1533_p13 = pnand %p1532_p1, %p1700_p9 }
 0x591   : > { %p1538_p2 = por %p1537_p8, %p1536_p0 }
 0x592   : > { %p1534_p3 = pneg %p1533_p13 }
 0x594   : > { %p1539_p5 = pnand %p1538_p2, %p1534_p3 }
 0x596   : > { %1542 = shalt.err (!%p1539_p5)
}
 0x597   : > { %s1612_s11 = smov 64   ;;  %s1613_s27 = smov 4  }
 0x598   : > { %1364 = dma.vmem_to_hbm [thread:$0]  (%p1700_p9), %s1888_s19, 128, %s1886_s29, %s1041_s24, %s1612_s11, %s1612_s11, %s1613_s27  }
 0x599 PF: > { %s1070_s17 = sand.u32 1, %s1581_s21   ;;  %p1374_p6 = pnand %p1248_p12, %p1707_p11 }
 0x59a   : > { %s1071_s8 = scalar_lea.sflag [#allocation4], %s1070_s17 }
 0x59b   : > { %p1375_p4 = pneg %p1374_p6 }
 0x59d   : > { %1576 = dma.done.wait (%p1375_p4), %s1071_s8, 128  }
 0x59e   : > { %1578 = vsyncadd (%p1375_p4), %s1071_s8, 4294967168  ;;  %s25_s26 = sadd.s32 1, %s1601_s26   ;;  %s1958_s30 = sld [smem:[#allocation11_spill]] }
 0x59f   : > { %p22_p7 = scmp.ge.s32.totalorder %s25_s26, 4   ;;  %s1959_s23 = sld [smem:[#allocation13_spill]] }
 0x5a0   : > { %s1960_s10 = sld [smem:[#allocation12_spill]]  ;;  %s1961_s21 = smov %s1585_s22 }
 0x5a1   : > { %s1963_s24 = smov %s1597_s25 }
 0x5a2   :  { %24 = sbr.rel (!%p22_p7) target bundleno = 10 (0xa), region = 120 }
 0x5a4   : > { %s1962_s22 = smov %s1958_s30 }
 0x5a6   : > { %s1964_s25 = smov %s1960_s10 }
 0x5a7   :  { %1076 = vsyncpa [#allocation3], 1 }
 0x5a8   :  { %1078 = vsyncpa [#allocation3 + $0x1], 1 }
 0x5a9   :  { %1079 = vsyncpa [#allocation6], 1 }
 0x5aa   :  { %1081 = vsyncpa [#allocation6 + $0x1], 1 }
 0x5ab   :  { %1082 = vsyncpa [#allocation4], 1 }
 0x5ac   :  { %1084 = vsyncpa [#allocation4 + $0x1], 1 }

</bundles_post_ra>
